<compile_context>
chip_gen: v7x
topology: tpu7x:2x2x1
jax: 0.10.0
libtpu: 0.0.40
codegen_flags: <defaults>
</compile_context>

<pallas_src>
import jax
import jax.numpy as jnp
from jax import lax
from jax.experimental import pallas as pl
from jax.experimental.pallas import tpu as pltpu


_DOT_KW = dict(preferred_element_type=jnp.float32,
               precision=lax.Precision.HIGHEST)


def _sigmoid(z):
    # Single-transcendental sigmoid: one EUP tanh instead of exp + divide.
    return 0.5 * jnp.tanh(0.5 * z) + 0.5


def _mlp_feature_major_kernel(w1_ref, b1_ref, w2_ref, b2_ref, w3_ref, b3_ref,
                              x_ref, o_ref):
    # x_ref: [8, TB]  (feature-major: batch on the 128-lane axis)
    x = x_ref[...].astype(jnp.float32)
    h1 = _sigmoid(jnp.dot(w1_ref[...], x, **_DOT_KW) + b1_ref[...])    # [6, TB]
    h2 = _sigmoid(jnp.dot(w2_ref[...], h1, **_DOT_KW) + b2_ref[...])   # [4, TB]
    o_ref[...] = _sigmoid(jnp.dot(w3_ref[...], h2, **_DOT_KW) + b3_ref[...])


def _mlp_fused_transpose_kernel(w1_ref, b1_ref, w2_ref, b2_ref, w3_ref, b3_ref,
                                x_ref, o_ref):
    # x_ref: [TB, 8] (PyTorch batch-major). Transpose in-kernel (XLU slot) so x
    # is DMA'd from HBM exactly once, then proceed feature-major.
    x = x_ref[...].astype(jnp.float32).T                               # [8, TB]
    h1 = _sigmoid(jnp.dot(w1_ref[...], x, **_DOT_KW) + b1_ref[...])    # [6, TB]
    h2 = _sigmoid(jnp.dot(w2_ref[...], h1, **_DOT_KW) + b2_ref[...])   # [4, TB]
    o_ref[...] = _sigmoid(jnp.dot(w3_ref[...], h2, **_DOT_KW) + b3_ref[...])


def _const(i):
    return (0, 0)


def _weight_specs():
    # Weights / biases: full-array blocks with constant index_maps -> DMA'd once,
    # resident in VMEM for the whole grid.
    return [
        pl.BlockSpec((6, 8), _const),
        pl.BlockSpec((6, 1), _const),
        pl.BlockSpec((4, 6), _const),
        pl.BlockSpec((4, 1), _const),
        pl.BlockSpec((1, 4), _const),
        pl.BlockSpec((1, 1), _const),
    ]


def _clamp_block(n, block_n):
    # Always a multiple of 128 lanes; shrink for small inputs.
    return min(block_n, pl.cdiv(max(n, 1), 128) * 128)


def mlp_forward_feature_major(xt, w1, b1, w2, b2, w3, b3, *, block_n=131072):
    """Preferred entry point. xt: [8, N] feature-major. Returns [1, N] f32.

    x tile = 8*block_n*4 B (no lane padding), double-buffered; ~16 MiB total
    VMEM at the 128K default, per-step DMA ~4 MiB -> HBM-roofline on all gens.
    """
    n = xt.shape[1]
    block_n = _clamp_block(n, block_n)
    return pl.pallas_call(
        _mlp_feature_major_kernel,
        out_shape=jax.ShapeDtypeStruct((1, n), jnp.float32),
        grid=(pl.cdiv(n, block_n),),
        in_specs=_weight_specs() + [pl.BlockSpec((8, block_n), lambda i: (0, i))],
        out_specs=pl.BlockSpec((1, block_n), lambda i: (0, i)),
        compiler_params=pltpu.CompilerParams(
            dimension_semantics=("parallel",),
            vmem_limit_bytes=32 * 1024 * 1024),
    )(w1, b1, w2, b2, w3, b3, xt)


def mlp_forward(x, w1, b1, w2, b2, w3, b3, *, block_n=16384):
    """PyTorch-layout entry point. x: [N, 8]. Returns [N, 1] f32.

    The [N, 8] -> [8, N] transpose is fused into the kernel, so x makes a single
    HBM->VMEM trip.  block_n capped at 16K: the (block_n, 8) f32 VMEM block
    lane-pads 8 -> 128 (512 B/column), 2 x 8 MiB buffers at the default.
    """
    n = x.shape[0]
    block_n = _clamp_block(n, block_n)
    out = pl.pallas_call(
        _mlp_fused_transpose_kernel,
        out_shape=jax.ShapeDtypeStruct((1, n), jnp.float32),
        grid=(pl.cdiv(n, block_n),),
        in_specs=_weight_specs() + [pl.BlockSpec((block_n, 8), lambda i: (i, 0))],
        out_specs=pl.BlockSpec((1, block_n), lambda i: (0, i)),
        compiler_params=pltpu.CompilerParams(
            dimension_semantics=("parallel",),
            vmem_limit_bytes=32 * 1024 * 1024),
    )(w1, b1, w2, b2, w3, b3, x)
    return out.T    # [1, N] -> [N, 1]; layout-identical, essentially free


def init_params(key):
    """Deterministic init mimicking nn.Linear's U(-1/sqrt(fan_in), 1/sqrt(fan_in)).

    Weights stored as [out, in] (PyTorch layout), biases as [out, 1]."""
    dims = [(8, 6), (6, 4), (4, 1)]
    params = []
    for i, (fan_in, fan_out) in enumerate(dims):
        kw, kb = jax.random.split(jax.random.fold_in(key, i))
        bound = 1.0 / (fan_in ** 0.5)
        w = jax.random.uniform(kw, (fan_out, fan_in), jnp.float32, -bound, bound)
        b = jax.random.uniform(kb, (fan_out, 1), jnp.float32, -bound, bound)
        params += [w, b]
    return params


if __name__ == "__main__":
    key = jax.random.PRNGKey(0)
    kx, kp = jax.random.split(key)

    batch = 16
    x = jax.random.normal(kx, (batch, 8), dtype=jnp.float32)
    w1, b1, w2, b2, w3, b3 = init_params(kp)

    # Plain-JAX reference (batch-major, PyTorch-style [out, in] weights).
    ref = jax.nn.sigmoid(x @ w1.T + b1[:, 0])
    ref = jax.nn.sigmoid(ref @ w2.T + b2[:, 0])
    ref = jax.nn.sigmoid(ref @ w3.T + b3[:, 0])          # [batch, 1]

    # PyTorch-layout path (fused in-kernel transpose).
    out = mlp_forward(x, w1, b1, w2, b2, w3, b3)
    out = jax.block_until_ready(out)
    assert out.shape == (batch, 1)
    assert jnp.allclose(out, ref, atol=1e-5), "mismatch vs reference (fused path)"

    # Feature-major fast path.
    out_fm = mlp_forward_feature_major(x.T, w1, b1, w2, b2, w3, b3)
    out_fm = jax.block_until_ready(out_fm)
    assert out_fm.shape == (1, batch)
    assert jnp.allclose(out_fm.T, ref, atol=1e-5), "mismatch vs reference (feature-major path)"

    print("KERNEL_OK")
</pallas_src>

<mosaic_0001>
module attributes {stable_mosaic.version = 11 : i64} {
  func.func @_mlp_fused_transpose_kernel(%arg0: i32, %arg1: memref<6x8xf32, #tpu.memory_space<vmem>>, %arg2: memref<6x1xf32, #tpu.memory_space<vmem>>, %arg3: memref<4x6xf32, #tpu.memory_space<vmem>>, %arg4: memref<4x1xf32, #tpu.memory_space<vmem>>, %arg5: memref<1x4xf32, #tpu.memory_space<vmem>>, %arg6: memref<1x1xf32, #tpu.memory_space<vmem>>, %arg7: memref<128x8xf32, #tpu.memory_space<vmem>>, %arg8: memref<1x128xf32, #tpu.memory_space<vmem>>) attributes {dimension_semantics = [#tpu.dimension_semantics<parallel>], iteration_bounds = array<i64: 1>, scalar_prefetch = 0 : i64, scratch_operands = 0 : i64, tpu.core_type = #tpu.core_type<tc>, window_params = [{pipeline_mode = #tpu.pipeline_mode<synchronous>, transform_indices = @transform_0, window_bounds = array<i64: 6, 8>}, {pipeline_mode = #tpu.pipeline_mode<synchronous>, transform_indices = @transform_1, window_bounds = array<i64: 6, 1>}, {pipeline_mode = #tpu.pipeline_mode<synchronous>, transform_indices = @transform_2, window_bounds = array<i64: 4, 6>}, {pipeline_mode = #tpu.pipeline_mode<synchronous>, transform_indices = @transform_3, window_bounds = array<i64: 4, 1>}, {pipeline_mode = #tpu.pipeline_mode<synchronous>, transform_indices = @transform_4, window_bounds = array<i64: 1, 4>}, {pipeline_mode = #tpu.pipeline_mode<synchronous>, transform_indices = @transform_5, window_bounds = array<i64: 1, 1>}, {transform_indices = @transform_6, window_bounds = array<i64: 128, 8>}, {transform_indices = @transform_7, window_bounds = array<i64: 1, 128>}]} {
    %c0 = arith.constant 0 : index
    %c0_0 = arith.constant 0 : index
    %0 = vector.load %arg7[%c0, %c0_0] : memref<128x8xf32, #tpu.memory_space<vmem>>, vector<128x8xf32>
    %1 = tpu.transpose %0, [1, 0] : vector<128x8xf32> -> vector<8x128xf32>
    %c0_1 = arith.constant 0 : index
    %c0_2 = arith.constant 0 : index
    %2 = vector.load %arg1[%c0_1, %c0_2] : memref<6x8xf32, #tpu.memory_space<vmem>>, vector<6x8xf32>
    %cst = arith.constant dense<0.000000e+00> : vector<6x128xf32>
    %3 = tpu.matmul %2, %1, %cst {dimension_numbers = #tpu.dot_dimension_numbers<[1], [0], [0], [1], [0, 0, 1, 1], [], []>, precision = #tpu.contract_precision<fp32>} : vector<6x8xf32>, vector<8x128xf32>, vector<6x128xf32> -> vector<6x128xf32>
    %c0_3 = arith.constant 0 : index
    %c0_4 = arith.constant 0 : index
    %4 = vector.load %arg2[%c0_3, %c0_4] : memref<6x1xf32, #tpu.memory_space<vmem>>, vector<6x1xf32>
    %5 = vector.broadcast %4 : vector<6x1xf32> to vector<6x128xf32>
    %6 = arith.addf %3, %5 : vector<6x128xf32>
    %cst_5 = arith.constant 5.000000e-01 : f32
    %7 = vector.broadcast %cst_5 : f32 to vector<6x128xf32>
    %8 = arith.mulf %7, %6 : vector<6x128xf32>
    %9 = math.tanh %8 : vector<6x128xf32>
    %cst_6 = arith.constant 5.000000e-01 : f32
    %10 = vector.broadcast %cst_6 : f32 to vector<6x128xf32>
    %11 = arith.mulf %10, %9 : vector<6x128xf32>
    %cst_7 = arith.constant 5.000000e-01 : f32
    %12 = vector.broadcast %cst_7 : f32 to vector<6x128xf32>
    %13 = arith.addf %11, %12 : vector<6x128xf32>
    %c0_8 = arith.constant 0 : index
    %c0_9 = arith.constant 0 : index
    %14 = vector.load %arg3[%c0_8, %c0_9] : memref<4x6xf32, #tpu.memory_space<vmem>>, vector<4x6xf32>
    %cst_10 = arith.constant dense<0.000000e+00> : vector<4x128xf32>
    %15 = tpu.matmul %14, %13, %cst_10 {dimension_numbers = #tpu.dot_dimension_numbers<[1], [0], [0], [1], [0, 0, 1, 1], [], []>, precision = #tpu.contract_precision<fp32>} : vector<4x6xf32>, vector<6x128xf32>, vector<4x128xf32> -> vector<4x128xf32>
    %c0_11 = arith.constant 0 : index
    %c0_12 = arith.constant 0 : index
    %16 = vector.load %arg4[%c0_11, %c0_12] : memref<4x1xf32, #tpu.memory_space<vmem>>, vector<4x1xf32>
    %17 = vector.broadcast %16 : vector<4x1xf32> to vector<4x128xf32>
    %18 = arith.addf %15, %17 : vector<4x128xf32>
    %cst_13 = arith.constant 5.000000e-01 : f32
    %19 = vector.broadcast %cst_13 : f32 to vector<4x128xf32>
    %20 = arith.mulf %19, %18 : vector<4x128xf32>
    %21 = math.tanh %20 : vector<4x128xf32>
    %cst_14 = arith.constant 5.000000e-01 : f32
    %22 = vector.broadcast %cst_14 : f32 to vector<4x128xf32>
    %23 = arith.mulf %22, %21 : vector<4x128xf32>
    %cst_15 = arith.constant 5.000000e-01 : f32
    %24 = vector.broadcast %cst_15 : f32 to vector<4x128xf32>
    %25 = arith.addf %23, %24 : vector<4x128xf32>
    %c0_16 = arith.constant 0 : index
    %c0_17 = arith.constant 0 : index
    %26 = vector.load %arg5[%c0_16, %c0_17] : memref<1x4xf32, #tpu.memory_space<vmem>>, vector<1x4xf32>
    %cst_18 = arith.constant dense<0.000000e+00> : vector<1x128xf32>
    %27 = tpu.matmul %26, %25, %cst_18 {dimension_numbers = #tpu.dot_dimension_numbers<[1], [0], [0], [1], [0, 0, 1, 1], [], []>, precision = #tpu.contract_precision<fp32>} : vector<1x4xf32>, vector<4x128xf32>, vector<1x128xf32> -> vector<1x128xf32>
    %c0_19 = arith.constant 0 : index
    %c0_20 = arith.constant 0 : index
    %28 = vector.load %arg6[%c0_19, %c0_20] : memref<1x1xf32, #tpu.memory_space<vmem>>, vector<1x1xf32>
    %29 = vector.broadcast %28 : vector<1x1xf32> to vector<1x128xf32>
    %30 = arith.addf %27, %29 : vector<1x128xf32>
    %cst_21 = arith.constant 5.000000e-01 : f32
    %31 = vector.broadcast %cst_21 : f32 to vector<1x128xf32>
    %32 = arith.mulf %31, %30 : vector<1x128xf32>
    %33 = math.tanh %32 : vector<1x128xf32>
    %cst_22 = arith.constant 5.000000e-01 : f32
    %34 = vector.broadcast %cst_22 : f32 to vector<1x128xf32>
    %35 = arith.mulf %34, %33 : vector<1x128xf32>
    %cst_23 = arith.constant 5.000000e-01 : f32
    %36 = vector.broadcast %cst_23 : f32 to vector<1x128xf32>
    %37 = arith.addf %35, %36 : vector<1x128xf32>
    %c0_24 = arith.constant 0 : index
    %c0_25 = arith.constant 0 : index
    %38 = vector.load %arg8[%c0_24, %c0_25] : memref<1x128xf32, #tpu.memory_space<vmem>>, vector<1x128xf32>
    tpu.vector_store %arg8[%c0_24, %c0_25], %37 {strides = array<i32>} : memref<1x128xf32, #tpu.memory_space<vmem>>, vector<1x128xf32>,
    return
  }
  func.func @transform_0(%arg0: i32) -> (i32, i32) {
    %c0_i32 = arith.constant 0 : i32
    %c0_i32_0 = arith.constant 0 : i32
    %c0_i32_1 = arith.constant 0 : i32
    return %c0_i32, %c0_i32_0 : i32, i32
  }
  func.func @transform_1(%arg0: i32) -> (i32, i32) {
    %c0_i32 = arith.constant 0 : i32
    %c0_i32_0 = arith.constant 0 : i32
    %c0_i32_1 = arith.constant 0 : i32
    return %c0_i32, %c0_i32_0 : i32, i32
  }
  func.func @transform_2(%arg0: i32) -> (i32, i32) {
    %c0_i32 = arith.constant 0 : i32
    %c0_i32_0 = arith.constant 0 : i32
    %c0_i32_1 = arith.constant 0 : i32
    return %c0_i32, %c0_i32_0 : i32, i32
  }
  func.func @transform_3(%arg0: i32) -> (i32, i32) {
    %c0_i32 = arith.constant 0 : i32
    %c0_i32_0 = arith.constant 0 : i32
    %c0_i32_1 = arith.constant 0 : i32
    return %c0_i32, %c0_i32_0 : i32, i32
  }
  func.func @transform_4(%arg0: i32) -> (i32, i32) {
    %c0_i32 = arith.constant 0 : i32
    %c0_i32_0 = arith.constant 0 : i32
    %c0_i32_1 = arith.constant 0 : i32
    return %c0_i32, %c0_i32_0 : i32, i32
  }
  func.func @transform_5(%arg0: i32) -> (i32, i32) {
    %c0_i32 = arith.constant 0 : i32
    %c0_i32_0 = arith.constant 0 : i32
    %c0_i32_1 = arith.constant 0 : i32
    return %c0_i32, %c0_i32_0 : i32, i32
  }
  func.func @transform_6(%arg0: i32) -> (i32, i32) {
    %c0_i32 = arith.constant 0 : i32
    %c0_i32_0 = arith.constant 0 : i32
    return %arg0, %c0_i32 : i32, i32
  }
  func.func @transform_7(%arg0: i32) -> (i32, i32) {
    %c0_i32 = arith.constant 0 : i32
    %c0_i32_0 = arith.constant 0 : i32
    return %c0_i32, %arg0 : i32, i32
  }
}

</mosaic_0001>

<bundles_post_ra>
// kernel: tpu_custom_call.1
= control target key start
LH: loop header
LB: loop body
LE: loop exit
PB: predicated region body
PF: predicated region fallthrough
CT: control target
= control target key end

     0   :  { %s2698_s0 = inlined_call_operand.vmem [shape: f32[6,8], index: 0, kind: input, shape index: {}]   ;;  %s2699_s1 = inlined_call_operand.vmem [shape: f32[6,1], index: 1, kind: input, shape index: {}]   ;;  %s2700_s2 = inlined_call_operand.vmem [shape: f32[4,6], index: 2, kind: input, shape index: {}]   ;;  %s2701_s3 = inlined_call_operand.vmem [shape: f32[4,1], index: 3, kind: input, shape index: {}]   ;;  %s2702_s4 = inlined_call_operand.vmem [shape: f32[1,4], index: 4, kind: input, shape index: {}]   ;;  %s2703_s5 = inlined_call_operand.<no memory space> [shape: f32[1,1], index: 5, kind: input, shape index: {}]   ;;  %s2704_s6 = inlined_call_operand.vmem [shape: f32[16,8], index: 6, kind: input, shape index: {}]   ;;  %s2705_s7 = inlined_call_operand.hbm [shape: f32[1,16], index: 7, kind: output, shape index: {}]  }
   0x1   :  { %v12_v0 = vstv %s2703_s5 }
   0x2   :  { %13 = vst [vmem:[#allocation2] sm:$0x1] %v12_v0 }
   0x3   :  { %v29_v1 = vld [vmem:[%s2704_s6] sm:$0xff]  ;;  %v30_v2 = vld [vmem:[%s2704_s6 + $0x8] sm:$0xff]  ;;  %vm52_vm0 = vcmask 64512   ;;  %v31_v3 = vld [vmem:[%s2704_s6 + $0x10] sm:$0xff]  ;;  %v2307_v4 = vmov 0.0|0.0  }
   0x4   :  { %2094 = vmatprep.subr.bf16.mxu1 %v2307_v4  ;;  %2166 = vmatprep.subr.bf16.mxu0 %v2307_v4  ;;  %v57_v5 = vsel %vm52_vm0, %v29_v1, 0  ;;  %v60_v6 = vsel %vm52_vm0, %v30_v2, 0  ;;  %v32_v7 = vld [vmem:[%s2704_s6 + $0x18] sm:$0xff]  ;;  %v63_v10 = vsel %vm52_vm0, %v31_v3, 0 }
   0x5   :  { %v105_v8 = vand.u32 4294901760, %v57_v5  ;;  %v108_v9 = vand.u32 4294901760, %v60_v6  ;;  %v66_v11 = vsel %vm52_vm0, %v32_v7, 0  ;;  %v111_v13 = vand.u32 4294901760, %v63_v10 }
   0x6   :  { %v114_v14 = vand.u32 4294901760, %v66_v11 }
   0x7   :  { %v2373_v12 = vpack.c.bf16 %v108_v9, %v105_v8 }
   0x9   :  { %2096 = vmatpush3.bf16.xpose.msra.mxu1 %v2373_v12  ;;  %2168 = vmatpush3.bf16.xpose.msra.mxu0 %v2373_v12 }
   0xa   :  { %2097 = vmatprep.subr.bf16.mxu1 %v2307_v4  ;;  %2169 = vmatprep.subr.bf16.mxu0 %v2307_v4 }
   0xb   :  { %14 = vsyncpa [#allocation4], 0  ;;  %v33_v15 = vld [vmem:[%s2704_s6 + $0x20] sm:$0xff]  ;;  %v34_v16 = vld [vmem:[%s2704_s6 + $0x28] sm:$0xff]  ;;  %v2385_v17 = vpack.c.bf16 %v114_v14, %v111_v13  ;;  %vm2308_vm1 = vmmov 0   ;;  %v2309_v24 = vmov 0.0   ;;  %v2421_v35 = vsub.f32 %v57_v5, %v105_v8 }
   0xc   :  { %v69_v18 = vsel %vm52_vm0, %v33_v15, 0  ;;  %v72_v19 = vsel %vm52_vm0, %v34_v16, 0  ;;  %v35_v22 = vld [vmem:[%s2704_s6 + $0x30] sm:$0xff]  ;;  %v36_v23 = vld [vmem:[%s2704_s6 + $0x38] sm:$0xff]  ;;  %1856 = vmatprep.mubr.msk.f32.mxu1 %vm2308_vm1, %v2309_v24  ;;  %1961 = vmatprep.mubr.msk.f32.mxu0 %vm2308_vm1, %v2309_v24  ;;  %v37_v30 = vld [vmem:[%s2704_s6 + $0x40] sm:$0xff]  ;;  %v2423_v36 = vsub.f32 %v60_v6, %v108_v9  ;;  %v2425_v37 = vsub.f32 %v63_v10, %v111_v13 }
   0xd   :  { %v117_v20 = vand.u32 4294901760, %v69_v18  ;;  %v120_v21 = vand.u32 4294901760, %v72_v19  ;;  %v75_v26 = vsel %vm52_vm0, %v35_v22, 0  ;;  %v78_v27 = vsel %vm52_vm0, %v36_v23, 0  ;;  %v38_v31 = vld [vmem:[%s2704_s6 + $0x48] sm:$0xff]  ;;  %v39_v44 = vld [vmem:[%s2704_s6 + $0x50] sm:$0xff] }
   0xe   :  { %v123_v28 = vand.u32 4294901760, %v75_v26  ;;  %v126_v29 = vand.u32 4294901760, %v78_v27  ;;  %v81_v32 = vsel %vm52_vm0, %v37_v30, 0  ;;  %v84_v34 = vsel %vm52_vm0, %v38_v31, 0  ;;  %v40_v45 = vld [vmem:[%s2704_s6 + $0x58] sm:$0xff]  ;;  %v41_v61 = vld [vmem:[%s2704_s6 + $0x60] sm:$0xff] }
   0xf   :  { %v2403_v25 = vpack.c.bf16 %v120_v21, %v117_v20  ;;  %v2427_v38 = vsub.f32 %v66_v11, %v114_v14  ;;  %v129_v39 = vand.u32 4294901760, %v81_v32  ;;  %v2429_v40 = vsub.f32 %v69_v18, %v117_v20  ;;  %v42_v62 = vld [vmem:[%s2704_s6 + $0x68] sm:$0xff]  ;;  %v45_v6 = vld [vmem:[%s2698_s0] sm:$0x3f]  ;;  %v43_v9 = vld [vmem:[%s2704_s6 + $0x70] sm:$0xff] }
  0x10   :  { %v2418_v33 = vpack.c.bf16 %v126_v29, %v123_v28  ;;  %v2431_v41 = vsub.f32 %v72_v19, %v120_v21  ;;  %v2433_v42 = vsub.f32 %v75_v26, %v123_v28  ;;  %v132_v43 = vand.u32 4294901760, %v84_v34  ;;  %v44_v10 = vld [vmem:[%s2704_s6 + $0x78] sm:$0xff] }
  0x11   :  { %2099 = vmatpush3.bf16.xpose.msra.mxu1 %v2385_v17  ;;  %2171 = vmatpush3.bf16.xpose.msra.mxu0 %v2385_v17  ;;  %v2442_v46 = vsub.f32 %v78_v27, %v126_v29  ;;  %v2445_v47 = vsub.f32 %v81_v32, %v129_v39  ;;  %v2143_v48 = vpack.c.bf16 %v2423_v36, %v2421_v35  ;;  %v87_v52 = vsel %vm52_vm0, %v39_v44, 0 }
  0x12   :  { %2100 = vmatprep.subr.bf16.mxu1 %v2307_v4  ;;  %2172 = vmatprep.subr.bf16.mxu0 %v2307_v4  ;;  %v2451_v49 = vsub.f32 %v84_v34, %v132_v43  ;;  %v2146_v50 = vpack.c.bf16 %v2427_v38, %v2425_v37  ;;  %v2149_v51 = vpack.c.bf16 %v2431_v41, %v2429_v40  ;;  %v90_v53 = vsel %vm52_vm0, %v40_v45, 0 }
  0x13   :  { %v2152_v54 = vpack.c.bf16 %v2442_v46, %v2433_v42  ;;  %v2463_v56 = vpack.c.bf16 %v132_v43, %v129_v39  ;;  %v135_v57 = vand.u32 4294901760, %v87_v52  ;;  %v138_v58 = vand.u32 4294901760, %v90_v53 }
  0x14   :  { %v2155_v55 = vpack.c.bf16 %v2451_v49, %v2445_v47  ;;  %v93_v0 = vsel %vm52_vm0, %v41_v61, 0  ;;  %v96_v1 = vsel %vm52_vm0, %v42_v62, 0  ;;  %v54_v11 = vsel %vm52_vm0, %v45_v6, 0 }
  0x15   :  { %v2465_v59 = vsub.f32 %v87_v52, %v135_v57  ;;  %v2467_v60 = vsub.f32 %v90_v53, %v138_v58  ;;  %v2483_v2 = vpack.c.bf16 %v138_v58, %v135_v57  ;;  %v141_v3 = vand.u32 4294901760, %v93_v0 }
  0x16   :  { %v144_v5 = vand.u32 4294901760, %v96_v1  ;;  %v99_v14 = vsel %vm52_vm0, %v43_v9, 0  ;;  %v102_v15 = vsel %vm52_vm0, %v44_v10, 0  ;;  %v2507_v16 = vand.u32 4294901760, %v54_v11 }
  0x17   :  { %v2158_v63 = vpack.c.bf16 %v2467_v60, %v2465_v59  ;;  %v2488_v7 = vsub.f32 %v93_v0, %v141_v3  ;;  %v147_v19 = vand.u32 4294901760, %v99_v14  ;;  %v150_v20 = vand.u32 4294901760, %v102_v15 }
  0x18   :  { %v2490_v8 = vsub.f32 %v96_v1, %v144_v5  ;;  %v2509_v18 = vpack.c.bf16 %v144_v5, %v141_v3  ;;  %v2516_v23 = vsub.f32 %v54_v11, %v2507_v16  ;;  %v198_v26 = vand.u32 4294901760, %v2421_v35  ;;  %v46_v5 = vld [vmem:[%s2699_s1] sm:$0x3f] }
  0x19   :  { %2102 = vmatpush3.bf16.xpose.msra.mxu1 %v2403_v25  ;;  %2174 = vmatpush3.bf16.xpose.msra.mxu0 %v2403_v25  ;;  %v2511_v21 = vsub.f32 %v99_v14, %v147_v19  ;;  %v2513_v22 = vsub.f32 %v102_v15, %v150_v20  ;;  %v205_v27 = vand.u32 4294901760, %v2423_v36  ;;  %v2527_v30 = vpack.c.bf16 %v150_v20, %v147_v19  ;;  %v750_v15 = vld [vmem:[%s2701_s3] sm:$0xf] }
  0x1a   :  { %2103 = vmatprep.subr.bf16.mxu1 %v2307_v4  ;;  %2175 = vmatprep.subr.bf16.mxu0 %v2307_v4  ;;  %v2161_v13 = vpack.c.bf16 %v2490_v8, %v2488_v7  ;;  %v187_v29 = vand.u32 4294901760, %v2516_v23  ;;  %v199_v31 = vsub.f32 %v2421_v35, %v198_v26  ;;  %v212_v44 = vand.u32 4294901760, %v2425_v37 }
  0x1b   :  { %v2164_v28 = vpack.c.bf16 %v2513_v22, %v2511_v21  ;;  %v206_v32 = vsub.f32 %v2423_v36, %v205_v27  ;;  %v219_v45 = vand.u32 4294901760, %v2427_v38  ;;  %v2191_v57 = vpack.c.bf16 %v205_v27, %v198_v26 }
  0x1c   :  { %v188_v34 = vsub.f32 %v2516_v23, %v187_v29  ;;  %v200_v39 = vand.u32 4294901760, %v199_v31  ;;  %v213_v58 = vsub.f32 %v2425_v37, %v212_v44  ;;  %v226_v62 = vand.u32 4294901760, %v2429_v40 }
  0x1d   :  { %v207_v43 = vand.u32 4294901760, %v206_v32  ;;  %v220_v61 = vsub.f32 %v2427_v38, %v219_v45  ;;  %v233_v3 = vand.u32 4294901760, %v2431_v41  ;;  %v2310_v6 = vmov 0  }
  0x1e   :  { %v189_v52 = vand.u32 4294901760, %v188_v34  ;;  %v214_v0 = vand.u32 4294901760, %v213_v58  ;;  %2275 = vset.pattern.permute.xlu0 %v2310_v6  ;;  %2276 = vset.pattern.permute.xlu1 %v2310_v6  ;;  %v2194_v10 = vpack.c.bf16 %v219_v45, %v212_v44  ;;  %v227_v11 = vsub.f32 %v2429_v40, %v226_v62 }
  0x1f   :  { %v2119_v53 = vpack.c.bf16 %v207_v43, %v200_v39  ;;  %v221_v1 = vand.u32 4294901760, %v220_v61  ;;  %v234_v14 = vsub.f32 %v2431_v41, %v233_v3  ;;  %49 = vperm.xlu0 %2275, %v46_v5   ;;  %v240_v26 = vand.u32 4294901760, %v2433_v42 }
  0x20   :  { %v228_v19 = vand.u32 4294901760, %v227_v11  ;;  %v247_v27 = vand.u32 4294901760, %v2442_v46  ;;  %v2197_v31 = vpack.c.bf16 %v233_v3, %v226_v62  ;;  %v254_v44 = vand.u32 4294901760, %v2445_v47 }
  0x21   :  { %2105 = vmatpush3.bf16.xpose.msra.mxu1 %v2418_v33  ;;  %2177 = vmatpush3.bf16.xpose.msra.mxu0 %v2418_v33  ;;  %v2122_v9 = vpack.c.bf16 %v221_v1, %v214_v0  ;;  %v235_v20 = vand.u32 4294901760, %v234_v14  ;;  %v241_v32 = vsub.f32 %v2433_v42, %v240_v26  ;;  %v261_v45 = vand.u32 4294901760, %v2451_v49 }
  0x22   :  { %2106 = vmatprep.subr.bf16.mxu1 %v2307_v4  ;;  %2178 = vmatprep.subr.bf16.mxu0 %v2307_v4  ;;  %v248_v34 = vsub.f32 %v2442_v46, %v247_v27  ;;  %v268_v0 = vand.u32 4294901760, %v2465_v59  ;;  %v275_v1 = vand.u32 4294901760, %v2467_v60  ;;  %v282_v14 = vand.u32 4294901760, %v2488_v7 }
  0x23   :  { %753 = vperm.xlu0 %2275, %v750_v15   ;;  %v242_v39 = vand.u32 4294901760, %v241_v32  ;;  %v262_v58 = vsub.f32 %v2451_v49, %v261_v45  ;;  %v2203_v5 = vpack.c.bf16 %v261_v45, %v254_v44  ;;  %v289_v15 = vand.u32 4294901760, %v2490_v8 }
  0x24   :  { %v249_v43 = vand.u32 4294901760, %v248_v34  ;;  %v269_v6 = vsub.f32 %v2465_v59, %v268_v0  ;;  %v296_v32 = vand.u32 4294901760, %v2511_v21  ;;  %v303_v34 = vand.u32 4294901760, %v2513_v22 }
  0x25   :  { %v263_v62 = vand.u32 4294901760, %v262_v58  ;;  %vm756_vm2 = vcmask 48128   ;;  %vm760_vm3 = vcmask 1045504   ;;  %vm1225_vm4 = vcmask 31744  }
  0x26   :  { %v304_v45 = vsub.f32 %v2513_v22, %v303_v34  ;;  %v2212_v58 = vpack.c.bf16 %v303_v34, %v296_v32  ;;  %vm1229_vm5 = vcmask 1043456  }
  0x29   :  { %2108 = vmatpush3.bf16.xpose.msra.mxu1 %v2463_v56  ;;  %2180 = vmatpush3.bf16.xpose.msra.mxu0 %v2463_v56 }
  0x2a   :  { %2109 = vmatprep.subr.bf16.mxu1 %v2307_v4  ;;  %2181 = vmatprep.subr.bf16.mxu0 %v2307_v4 }
  0x31   :  { %2111 = vmatpush3.bf16.xpose.msra.mxu1 %v2483_v2  ;;  %2183 = vmatpush3.bf16.xpose.msra.mxu0 %v2483_v2 }
  0x32   :  { %2112 = vmatprep.subr.bf16.mxu1 %v2307_v4  ;;  %2184 = vmatprep.subr.bf16.mxu0 %v2307_v4 }
  0x39   :  { %2114 = vmatpush3.bf16.xpose.msra.mxu1 %v2509_v18  ;;  %2186 = vmatpush3.bf16.xpose.msra.mxu0 %v2509_v18 }
  0x3a   :  { %2115 = vmatprep.subr.bf16.mxu1 %v2307_v4  ;;  %2187 = vmatprep.subr.bf16.mxu0 %v2307_v4 }
  0x41   :  { %2117 = vmatpush3.bf16.xpose.msra.mxu1 %v2527_v30  ;;  %2189 = vmatpush3.bf16.xpose.msra.mxu0 %v2527_v30 }
  0x42   :  { %2118 = vmatprep.subr.bf16.mxu1 %v2307_v4  ;;  %2190 = vmatprep.subr.bf16.mxu0 %v2307_v4 }
  0x48   :  { %1857 = vmatmul.mubr.f32.vlgmr.msra.gmra.mrb[0].mxu1 %v189_v52  ;;  %1962 = vmatmul.mubr.f32.vlgmr.msra.gmra.mrb[0].mxu0 %v187_v29  ;;  %v2125_v29 = vpack.c.bf16 %v235_v20, %v228_v19  ;;  %v2128_v52 = vpack.c.bf16 %v249_v43, %v242_v39  ;;  %v2206_v20 = vpack.c.bf16 %v275_v1, %v268_v0 }
  0x49   :  { %2120 = vmatpush3.bf16.xpose.msra.mxu1 %v2119_v53  ;;  %2192 = vmatpush3.bf16.xpose.msra.mxu0 %v2191_v57  ;;  %v2200_v53 = vpack.c.bf16 %v247_v27, %v240_v26  ;;  %v255_v57 = vsub.f32 %v2445_v47, %v254_v44  ;;  %v283_v26 = vsub.f32 %v2488_v7, %v282_v14  ;;  %v1214_v7 = vld [vmem:[%s2702_s4] sm:$0x1]  ;;  %s2311_s4 = smov [#allocation3]  }
  0x4a   :  { %2121 = vmatprep.subr.bf16.mxu1 %v2307_v4  ;;  %2193 = vmatprep.subr.bf16.mxu0 %v2307_v4  ;;  %v290_v27 = vsub.f32 %v2490_v8, %v289_v15  ;;  %v2209_v43 = vpack.c.bf16 %v289_v15, %v282_v14  ;;  %v297_v44 = vsub.f32 %v2511_v21, %v296_v32  ;;  %v1227_v21 = vsel %vm1225_vm4, %v1214_v7, 0  ;;  %s1690_s15 = sshll.u32 %s2311_s4, 4  ;;  %s1691_s15 = int_to_ptr.vmem [resolvable:$true] %s1690_s15 }
  0x4b   :  { %1891 = vmatprep.mubr.msk.f32.mxu1 %vm2308_vm1, %v2309_v24  ;;  %1996 = vmatprep.mubr.msk.f32.mxu0 %vm2308_vm1, %v2309_v24  ;;  %v256_v61 = vand.u32 4294901760, %v255_v57  ;;  %v1221_v15 = vlaneseq  ;;  %s2283_s16 = scalar_lea.vmem %s1691_s15, 16  ;;  %s2287_s17 = scalar_lea.vmem %s1691_s15, 32 }
  0x4c   :  { %p2284_p0 = scmp.ne.s32.totalorder %s1691_s15, %s2283_s16  ;;  %p2288_p1 = scmp.lt.s32.totalorder %s1691_s15, %s1691_s15 }
  0x4d   :  { %v2131_v3 = vpack.c.bf16 %v263_v62, %v256_v61  ;;  %p2289_p2 = scmp.lt.s32.totalorder %s2287_s17, %s2283_s16 }
  0x4f   :  { %p2290_p3 = por %p2289_p2, %p2288_p1 }
  0x51   :  { %2123 = vmatpush3.bf16.xpose.msra.mxu1 %v2122_v9  ;;  %2195 = vmatpush3.bf16.xpose.msra.mxu0 %v2194_v10  ;;  %v276_v9 = vsub.f32 %v2467_v60, %v275_v1  ;;  %v270_v10 = vand.u32 4294901760, %v269_v6  ;;  %p2291_p4 = pnand %p2290_p3, %p2284_p0 }
  0x52   :  { %2124 = vmatprep.subr.bf16.mxu1 %v2307_v4  ;;  %2196 = vmatprep.subr.bf16.mxu0 %v2307_v4 }
  0x53   :  { %v277_v11 = vand.u32 4294901760, %v276_v9 }
  0x55   :  { %v2134_v19 = vpack.c.bf16 %v277_v11, %v270_v10 }
  0x59   :  { %2126 = vmatpush3.bf16.xpose.msra.mxu1 %v2125_v29  ;;  %2198 = vmatpush3.bf16.xpose.msra.mxu0 %v2197_v31  ;;  %v284_v29 = vand.u32 4294901760, %v283_v26  ;;  %v291_v31 = vand.u32 4294901760, %v290_v27 }
  0x5a   :  { %2127 = vmatprep.subr.bf16.mxu1 %v2307_v4  ;;  %2199 = vmatprep.subr.bf16.mxu0 %v2307_v4 }
  0x5b   :  { %v2137_v39 = vpack.c.bf16 %v291_v31, %v284_v29 }
  0x61   :  { %2129 = vmatpush3.bf16.xpose.msra.mxu1 %v2128_v52  ;;  %2201 = vmatpush3.bf16.xpose.msra.mxu0 %v2200_v53  ;;  %v298_v52 = vand.u32 4294901760, %v297_v44  ;;  %v305_v53 = vand.u32 4294901760, %v304_v45 }
  0x62   :  { %2130 = vmatprep.subr.bf16.mxu1 %v2307_v4  ;;  %2202 = vmatprep.subr.bf16.mxu0 %v2307_v4 }
  0x63   :  { %v2140_v57 = vpack.c.bf16 %v305_v53, %v298_v52 }
  0x69   :  { %2132 = vmatpush3.bf16.xpose.msra.mxu1 %v2131_v3  ;;  %2204 = vmatpush3.bf16.xpose.msra.mxu0 %v2203_v5 }
  0x6a   :  { %2133 = vmatprep.subr.bf16.mxu1 %v2307_v4  ;;  %2205 = vmatprep.subr.bf16.mxu0 %v2307_v4 }
  0x71   :  { %2135 = vmatpush3.bf16.xpose.msra.mxu1 %v2134_v19  ;;  %2207 = vmatpush3.bf16.xpose.msra.mxu0 %v2206_v20  ;;  %v1222_v19 = vshrl.u32 %v1221_v15, 7 }
  0x72   :  { %2136 = vmatprep.subr.bf16.mxu1 %v2307_v4  ;;  %2208 = vmatprep.subr.bf16.mxu0 %v2307_v4 }
  0x73   :  { %v1223_v20 = vsub.s32 0, %v1222_v19 }
  0x79   :  { %2138 = vmatpush3.bf16.xpose.msra.mxu1 %v2137_v39  ;;  %2210 = vmatpush3.bf16.xpose.msra.mxu0 %v2209_v43 }
  0x7a   :  { %2139 = vmatprep.subr.bf16.mxu1 %v2307_v4  ;;  %2211 = vmatprep.subr.bf16.mxu0 %v2307_v4 }
  0x81   :  { %2141 = vmatpush3.bf16.xpose.msra.mxu1 %v2140_v57  ;;  %2213 = vmatpush3.bf16.xpose.msra.mxu0 %v2212_v58 }
  0x82   :  { %2142 = vmatprep.subr.bf16.mxu1 %v2307_v4  ;;  %2214 = vmatprep.subr.bf16.mxu0 %v2307_v4 }
  0x88   :  { %1892 = vmatmul.mubr.f32.vlgmr.msra.gmra.mrb[0].mxu1 %v2507_v16  ;;  %1997 = vmatmul.mubr.f32.vlgmr.msra.gmra.mrb[0].mxu0 %v2507_v16 }
  0x89   :  { %2144 = vmatpush3.bf16.xpose.msra.mxu1 %v2143_v48  ;;  %2216 = vmatpush3.bf16.xpose.msra.mxu0 %v2373_v12 }
  0x8a   :  { %2145 = vmatprep.subr.bf16.mxu1 %v2307_v4  ;;  %2217 = vmatprep.subr.bf16.mxu0 %v2307_v4 }
  0x8b   :  { %1926 = vmatprep.mubr.msk.f32.mxu1 %vm2308_vm1, %v2309_v24  ;;  %2031 = vmatprep.mubr.msk.f32.mxu0 %vm2308_vm1, %v2309_v24 }
  0x91   :  { %2147 = vmatpush3.bf16.xpose.msra.mxu1 %v2146_v50  ;;  %2219 = vmatpush3.bf16.xpose.msra.mxu0 %v2385_v17 }
  0x92   :  { %2148 = vmatprep.subr.bf16.mxu1 %v2307_v4  ;;  %2220 = vmatprep.subr.bf16.mxu0 %v2307_v4 }
  0x99   :  { %2150 = vmatpush3.bf16.xpose.msra.mxu1 %v2149_v51  ;;  %2222 = vmatpush3.bf16.xpose.msra.mxu0 %v2403_v25  ;;  %v749_v25 = vld [vmem:[%s2700_s2] sm:$0xf] }
  0x9a   :  { %2151 = vmatprep.subr.bf16.mxu1 %v2307_v4  ;;  %2223 = vmatprep.subr.bf16.mxu0 %v2307_v4  ;;  %v758_v38 = vsel %vm756_vm2, %v749_v25, 0 }
  0x9b   :  { %v830_v41 = vand.u32 4294901760, %v758_v38 }
  0x9d   :  { %v831_v42 = vsub.f32 %v758_v38, %v830_v41 }
  0x9f   :  { %v832_v46 = vand.u32 4294901760, %v831_v42 }
  0xa1   :  { %2153 = vmatpush3.bf16.xpose.msra.mxu1 %v2152_v54  ;;  %2225 = vmatpush3.bf16.xpose.msra.mxu0 %v2418_v33  ;;  %v833_v49 = vsub.f32 %v831_v42, %v832_v46 }
  0xa2   :  { %2154 = vmatprep.subr.bf16.mxu1 %v2307_v4  ;;  %2226 = vmatprep.subr.bf16.mxu0 %v2307_v4 }
  0xa3   :  { %v834_v54 = vand.u32 4294901760, %v833_v49 }
  0xa9   :  { %2156 = vmatpush3.bf16.xpose.msra.mxu1 %v2155_v55  ;;  %2228 = vmatpush3.bf16.xpose.msra.mxu0 %v2463_v56 }
  0xaa   :  { %2157 = vmatprep.subr.bf16.mxu1 %v2307_v4  ;;  %2229 = vmatprep.subr.bf16.mxu0 %v2307_v4 }
  0xb1   :  { %2159 = vmatpush3.bf16.xpose.msra.mxu1 %v2158_v63  ;;  %2231 = vmatpush3.bf16.xpose.msra.mxu0 %v2483_v2  ;;  %v1215_v2 = vld [vmem:[#allocation2] sm:$0x1] }
  0xb2   :  { %2160 = vmatprep.subr.bf16.mxu1 %v2307_v4  ;;  %2232 = vmatprep.subr.bf16.mxu0 %v2307_v4 }
  0xb3   :  { %1218 = vperm.xlu1 %2276, %v1215_v2  }
  0xb9   :  { %2162 = vmatpush3.bf16.xpose.msra.mxu1 %v2161_v13  ;;  %2234 = vmatpush3.bf16.xpose.msra.mxu0 %v2509_v18 }
  0xba   :  { %2163 = vmatprep.subr.bf16.mxu1 %v2307_v4  ;;  %2235 = vmatprep.subr.bf16.mxu0 %v2307_v4  ;;  %v50_v4 = vpop.permute.xlu0 %49 }
  0xbe   :  { %v754_v8 = vpop.permute.xlu0 %753 }
  0xc1   :  { %2165 = vmatpush3.bf16.xpose.msra.mxu1 %v2164_v28  ;;  %2237 = vmatpush3.bf16.xpose.msra.mxu0 %v2527_v30 }
  0xc2   :  { %2034 = vmatprep.subr.mxu0 %v2309_v24  ;;  %2064 = vmatprep.subr.mxu1 %v2309_v24 }
  0xc8   :  { %1927 = vmatmul.mubr.f32.vlgmr.msra.gmra.mrb[0].mxu1 %v2516_v23  ;;  %2032 = vmatmul.mubr.f32.vlgmr.msra.gmra.mrb[0].mxu0 %v2507_v16  ;;  %v1299_v23 = vand.u32 4294901760, %v1227_v21 }
  0xc9   :  { %2036 = vmatprep.mubr.msk.f32.mxu0 %vm2308_vm1, %v2309_v24  ;;  %2066 = vmatprep.mubr.msk.f32.mxu1 %vm2308_vm1, %v2309_v24 }
  0xca   :  { %v1300_v28 = vsub.f32 %v1227_v21, %v1299_v23 }
  0xcc   :  { %v1301_v30 = vand.u32 4294901760, %v1300_v28 }
  0xce   :  { %v1302_v0 = vsub.f32 %v1300_v28, %v1301_v30 }
  0xd0   :  { %v1303_v5 = vand.u32 4294901760, %v1302_v0 }
 0x132   :  { %v1219_v26 = vpop.permute.xlu1 %1218 }
 0x133   :  { %v1224_v27 = vrot.slane %v1219_v26, %v1223_v20 }
 0x19b   :  { %v446_v12 = vpop.f32.mrb[0].mxu1  ;;  %v741_v17 = vpop.f32.mrb[0].mxu0 }
 0x19c   :  { %v2238_v33 = vadd.f32 %v446_v12, %v50_v4  ;;  %v1928_v35 = vpop.f32.mrb[1].mxu1  ;;  %v2033_v36 = vpop.f32.mrb[1].mxu0 }
 0x19e   :  { %v2239_v37 = vadd.f32 %v2238_v33, %v741_v17 }
 0x1a0   :  { %v745_v40 = vmul.f32 0.5, %v2239_v37 }
 0x1a2   :  { %2277 = vtanh.f32 %v745_v40 }
 0x1ac   :  { %v2278_v47 = vpop.eup %2277 }
 0x1ad   :  { %v747_v48 = vmul.f32 0.5, %v2278_v47 }
 0x1af   :  { %v748_v50 = vadd.f32 0.5, %v747_v48 }
 0x1b1   :  { %v762_v51 = vsel %vm760_vm3, %v748_v50, 0 }
 0x1b2   :  { %v765_v55 = vand.u32 4294901760, %v762_v51 }
 0x1b4   :  { %2035 = vmatpush3.msra.mxu0 %v765_v55  ;;  %v842_v56 = vsub.f32 %v762_v51, %v765_v55 }
 0x1b5   :  { %2037 = vmatmul.mubr.f32.vlgmr.msra.gmra.mrb[2].mxu0 %v834_v54  ;;  %2039 = vmatprep.subr.mxu0 %v2309_v24 }
 0x1b6   :  { %v843_v59 = vand.u32 4294901760, %v842_v56  ;;  %2041 = vmatprep.mubr.msk.f32.mxu0 %vm2308_vm1, %v2309_v24 }
 0x1b8   :  { %v844_v60 = vsub.f32 %v842_v56, %v843_v59 }
 0x1ba   :  { %v845_v63 = vand.u32 4294901760, %v844_v60 }
 0x1bc   :  { %2040 = vmatpush3.msra.mxu0 %v845_v63 }
 0x1bd   :  { %2042 = vmatmul.mubr.f32.vlgmr.msra.gmra.mrb[2].mxu0 %v830_v41  ;;  %2044 = vmatprep.subr.mxu0 %v2309_v24 }
 0x1be   :  { %2045 = vmatpush3.msra.mxu0 %v842_v56  ;;  %2046 = vmatprep.mubr.msk.f32.mxu0 %vm2308_vm1, %v2309_v24 }
 0x1bf   :  { %2049 = vmatprep.subr.mxu0 %v2309_v24 }
 0x1c5   :  { %2047 = vmatmul.mubr.f32.vlgmr.msra.gmra.mrb[2].mxu0 %v831_v42 }
 0x1c6   :  { %2050 = vmatpush3.msra.mxu0 %v765_v55  ;;  %2051 = vmatprep.mubr.msk.f32.mxu0 %vm2308_vm1, %v2309_v24 }
 0x1c7   :  { %2054 = vmatprep.subr.mxu0 %v2309_v24 }
 0x1cd   :  { %2052 = vmatmul.mubr.f32.vlgmr.msra.gmra.mrb[2].mxu0 %v832_v46 }
 0x1ce   :  { %2055 = vmatpush3.msra.mxu0 %v843_v59  ;;  %2056 = vmatprep.mubr.msk.f32.mxu0 %vm2308_vm1, %v2309_v24 }
 0x1cf   :  { %2059 = vmatprep.subr.mxu0 %v2309_v24 }
 0x1d5   :  { %2057 = vmatmul.mubr.f32.vlgmr.msra.gmra.mrb[2].mxu0 %v830_v41 }
 0x1d6   :  { %2060 = vmatpush3.msra.mxu0 %v765_v55  ;;  %2061 = vmatprep.mubr.msk.f32.mxu0 %vm2308_vm1, %v2309_v24 }
 0x1dd   :  { %2062 = vmatmul.mubr.f32.vlgmr.msra.gmra.mrb[2].mxu0 %v830_v41 }
 0x2b0   :  { %v1206_v13 = vpop.f32.mrb[2].mxu0 }
 0x2b1   :  { %v2240_v16 = vadd.f32 %v1206_v13, %v754_v8  ;;  %v2063_v18 = vpop.f32.mrb[3].mxu0 }
 0x2b3   :  { %v1210_v22 = vmul.f32 0.5, %v2240_v16 }
 0x2b5   :  { %2279 = vtanh.f32 %v1210_v22 }
 0x2bf   :  { %v2280_v61 = vpop.eup %2279 }
 0x2c0   :  { %v1212_v62 = vmul.f32 0.5, %v2280_v61 }
 0x2c2   :  { %v1213_v1 = vadd.f32 0.5, %v1212_v62 }
 0x2c4   :  { %v1231_v3 = vsel %vm1229_vm5, %v1213_v1, 0 }
 0x2c5   :  { %v1234_v6 = vand.u32 4294901760, %v1231_v3 }
 0x2c7   :  { %2065 = vmatpush3.msra.mxu1 %v1234_v6  ;;  %v1311_v9 = vsub.f32 %v1231_v3, %v1234_v6 }
 0x2c8   :  { %2067 = vmatmul.mubr.f32.vlgmr.msra.gmra.mrb[2].mxu1 %v1303_v5  ;;  %2069 = vmatprep.subr.mxu1 %v2309_v24 }
 0x2c9   :  { %v1312_v10 = vand.u32 4294901760, %v1311_v9  ;;  %2071 = vmatprep.mubr.msk.f32.mxu1 %vm2308_vm1, %v2309_v24 }
 0x2cb   :  { %v1313_v11 = vsub.f32 %v1311_v9, %v1312_v10 }
 0x2cd   :  { %v1314_v14 = vand.u32 4294901760, %v1313_v11 }
 0x2cf   :  { %2070 = vmatpush3.msra.mxu1 %v1314_v14 }
 0x2d0   :  { %2072 = vmatmul.mubr.f32.vlgmr.msra.gmra.mrb[2].mxu1 %v1299_v23  ;;  %2074 = vmatprep.subr.mxu1 %v2309_v24 }
 0x2d1   :  { %2075 = vmatpush3.msra.mxu1 %v1311_v9  ;;  %2076 = vmatprep.mubr.msk.f32.mxu1 %vm2308_vm1, %v2309_v24 }
 0x2d2   :  { %2079 = vmatprep.subr.mxu1 %v2309_v24 }
 0x2d8   :  { %2077 = vmatmul.mubr.f32.vlgmr.msra.gmra.mrb[2].mxu1 %v1300_v28 }
 0x2d9   :  { %2080 = vmatpush3.msra.mxu1 %v1234_v6  ;;  %2081 = vmatprep.mubr.msk.f32.mxu1 %vm2308_vm1, %v2309_v24 }
 0x2da   :  { %2084 = vmatprep.subr.mxu1 %v2309_v24 }
 0x2e0   :  { %2082 = vmatmul.mubr.f32.vlgmr.msra.gmra.mrb[2].mxu1 %v1301_v30 }
 0x2e1   :  { %2085 = vmatpush3.msra.mxu1 %v1312_v10  ;;  %2086 = vmatprep.mubr.msk.f32.mxu1 %vm2308_vm1, %v2309_v24 }
 0x2e2   :  { %2089 = vmatprep.subr.mxu1 %v2309_v24 }
 0x2e8   :  { %2087 = vmatmul.mubr.f32.vlgmr.msra.gmra.mrb[2].mxu1 %v1299_v23 }
 0x2e9   :  { %2090 = vmatpush3.msra.mxu1 %v1234_v6  ;;  %2091 = vmatprep.mubr.msk.f32.mxu1 %vm2308_vm1, %v2309_v24 }
 0x2f0   :  { %2092 = vmatmul.mubr.f32.vlgmr.msra.gmra.mrb[2].mxu1 %v1299_v23 }
 0x3c3   :  { %v1675_v29 = vpop.f32.mrb[2].mxu1 }
 0x3c4   :  { %v2241_v31 = vadd.f32 %v1675_v29, %v1224_v27  ;;  %v2093_v32 = vpop.f32.mrb[3].mxu1 }
 0x3c6   :  { %v1679_v34 = vmul.f32 0.5, %v2241_v31 }
 0x3c8   :  { %2281 = vtanh.f32 %v1679_v34 }
 0x3d2   :  { %v2282_v39 = vpop.eup %2281 }
 0x3d3   :  { %v1681_v43 = vmul.f32 0.5, %v2282_v39 }
 0x3d5   :  { %v1682_v44 = vadd.f32 0.5, %v1681_v43 }
 0x3d7   :  { %1683 = vst [vmem:[#allocation3] sm:$0x1] %v1682_v44 }
 0x3d8   :  { %2294 = shalt.err (!%p2291_p4)
}
 0x3d9   :  { %s2295_s20 = scalar_lea.hbm %s2705_s7, 16 }
 0x3da   :  { %p2296_p5 = scmp.ne.s32.totalorder %s2705_s7, %s2295_s20  ;;  %p2299_p6 = scmp.lt.u32.totalorder %s2295_s20, %s2705_s7 }
 0x3dc   :  { %p2301_p7 = pnand %p2299_p6, %p2296_p5 }
 0x3de   :  { %2304 = shalt.err (!%p2301_p7)
}
 0x3df   :  { %1693 = dma.vmem_to_hbm [thread:$0]  %s1691_s15, 16, %s2705_s7, [#allocation4]  }
 0x3e0   :  { %2305 = dma.done.wait [#allocation4], 16  }
 0x3e1   :  { %2306 = vsyncadd [#allocation4], 4294967280 }
 0x3e2   :  { %1697 = vsyncpa [#allocation4], 1 }

</bundles_post_ra>
